<compile_context>
chip_gen: v5e
topology: v5e:2x2
jax: 0.10.0
libtpu: 0.0.40
codegen_flags: <defaults>
</compile_context>

<pallas_src>
import numpy as np
import jax
import jax.numpy as jnp
from jax import lax
from jax.experimental import pallas as pl
from jax.experimental.pallas import tpu as pltpu


def _conv_out(n):
    # torch Conv2d(kernel_size=3, stride=2, padding=0) output length
    return (n - 3) // 2 + 1


def _round_up(n, m):
    return ((n + m - 1) // m) * m


def _extract_double_patches(x, T2, F2):
    """x: (B, T, F) -> P: (B, F2*T2, 81) with
         P[b, f2*T2 + t2, j2*9 + j1] = x[b, 4*t2 + 2*kh2 + kh1, 4*f2 + 2*kw2 + kw1]
    where j2 = kh2*3 + kw2 (conv2 tap) and j1 = kh1*3 + kw1 (conv1 tap).
    Pure layout glue: 81 static strided slices done by XLA outside the kernel."""
    B = x.shape[0]
    cols = []
    for kh2 in range(3):
        for kw2 in range(3):
            for kh1 in range(3):
                for kw1 in range(3):
                    dt = 2 * kh2 + kh1
                    df = 2 * kw2 + kw1
                    sl = x[:, dt:dt + 4 * (T2 - 1) + 1:4, df:df + 4 * (F2 - 1) + 1:4]
                    cols.append(sl)                       # (B, T2, F2)
    p = jnp.stack(cols, axis=-1)                          # (B, T2, F2, 81)
    p = jnp.transpose(p, (0, 2, 1, 3))                    # (B, F2, T2, 81)  f2-major rows
    return p.reshape(B, F2 * T2, 81)


def conv2d_subsampling_forward(x, params, x_mask=None, compute_dtype=jnp.bfloat16):
    """Pallas forward of Conv2dSubsampling.

    x      : (B, 1, T, idim) float32 (NCHW, single channel) or (B, T, idim)
    returns: (y, mask') with y: (B, T2, odim), T2 = ((T-1)//2 - 1)//2
    """
    w1, b1, w2, b2, wl, bl = (params[k] for k in ("w1", "b1", "w2", "b2", "wl", "bl"))
    if x.ndim == 3:                       # (B, time, idim) as in the PyTorch docstring
        x = x[:, None, :, :]
    B, Cin, T, F = x.shape
    assert Cin == 1
    C = w1.shape[0]                       # odim (conv channels)
    ODIM = wl.shape[0]
    T1, F1 = _conv_out(T), _conv_out(F)
    T2, F2 = _conv_out(T1), _conv_out(F1)
    assert wl.shape[1] == C * F2
    R = F2 * T2                           # rows per image, f2-major then t2
    OP = _round_up(ODIM, 128)             # lane-dense output store, sliced below
    cdt = compute_dtype

    # ---- host-side weight re-layouts (data independent glue) ----
    # conv1 weights as block-diagonal (81, 9*C): block j2 holds w1[c,0,kh1,kw1]
    w1m = jnp.transpose(w1[:, 0], (1, 2, 0)).reshape(9, C)             # [j1, c]
    w1blk = jnp.kron(jnp.eye(9, dtype=jnp.float32), w1m)               # (81, 9*C)
    b1t = jnp.tile(b1, 9).reshape(1, 9 * C).astype(jnp.float32)        # bias per (j2, c)
    # conv2 weights as (9*C, C): row j2*C + ci, col co
    w2flat = jnp.transpose(w2, (2, 3, 1, 0)).reshape(9 * C, C)
    b2m = b2.reshape(1, C).astype(jnp.float32)
    # linear weights permuted to per-f2 (C, OP) slabs: wlm[f2, c, o] = wl[o, c*F2 + f2]
    wlm = jnp.transpose(wl.reshape(ODIM, C, F2), (2, 1, 0))            # (F2, C, ODIM)
    wlm = jnp.pad(wlm, ((0, 0), (0, 0), (0, OP - ODIM)))
    blm = jnp.pad(bl, (0, OP - ODIM)).reshape(1, OP).astype(jnp.float32)

    # ---- double im2col of the single-channel input (wrapper-side layout) ----
    P = _extract_double_patches(x[:, 0], T2, F2)                       # (B, R, 81)

    # bf16 MXU operands (f32 accumulation); biases stay f32.
    P = P.astype(cdt)
    w1blk = w1blk.astype(cdt)
    w2flat = w2flat.astype(cdt)
    wlm = wlm.astype(cdt)

    def kernel(p_ref, w1_ref, b1_ref, w2_ref, b2_ref, wl_ref, bl_ref, o_ref):
        # conv1 (1 -> C channels), all 9 conv2 taps at once: (R, 81) @ (81, 9*C)
        h1 = jnp.dot(p_ref[...], w1_ref[...], preferred_element_type=jnp.float32)
        h1 = jnp.maximum(h1 + b1_ref[...], 0.0).astype(cdt)            # (R, 9*C)
        # conv2 (C -> C channels) as a single K = 9*C contraction
        h2 = jnp.dot(h1, w2_ref[...], preferred_element_type=jnp.float32)
        h2 = jnp.maximum(h2 + b2_ref[...], 0.0).astype(cdt)            # (R, C), f2-major rows
        # Linear over (c, f2): F2 contiguous row blocks, K = C each
        y = jnp.zeros((T2, OP), jnp.float32)
        for f in range(F2):
            y = y + jnp.dot(h2[f * T2:(f + 1) * T2, :], wl_ref[f],
                            preferred_element_type=jnp.float32)
        o_ref[...] = (y + bl_ref[...]).astype(o_ref.dtype)

    def full(a):
        return pl.BlockSpec(a.shape, lambda b, _n=a.ndim: (0,) * _n)

    y = pl.pallas_call(
        kernel,
        out_shape=jax.ShapeDtypeStruct((B, T2, OP), jnp.float32),
        grid=(B,),
        in_specs=[
            pl.BlockSpec((None, R, 81), lambda b: (b, 0, 0)),          # per-batch patches
            full(w1blk), full(b1t), full(w2flat), full(b2m), full(wlm), full(blm),
        ],
        out_specs=pl.BlockSpec((None, T2, OP), lambda b: (b, 0, 0)),
        compiler_params=pltpu.CompilerParams(dimension_semantics=("parallel",)),
    )(P, w1blk, b1t, w2flat, b2m, wlm, blm)

    y = y[:, :, :ODIM]
    if x_mask is None:
        return y, None
    return y, x_mask[:, :, :-2:2][:, :, :-2:2]


def reference_forward(x, params, x_mask=None):
    """Pure-JAX reference matching the PyTorch module (eval mode)."""
    w1, b1, w2, b2, wl, bl = (params[k] for k in ("w1", "b1", "w2", "b2", "wl", "bl"))
    dn = ("NCHW", "OIHW", "NCHW")
    h = lax.conv_general_dilated(x, w1, (2, 2), "VALID", dimension_numbers=dn,
                                 precision=lax.Precision.HIGHEST)
    h = jnp.maximum(h + b1[None, :, None, None], 0.0)
    h = lax.conv_general_dilated(h, w2, (2, 2), "VALID", dimension_numbers=dn,
                                 precision=lax.Precision.HIGHEST)
    h = jnp.maximum(h + b2[None, :, None, None], 0.0)
    b, c, t, f = h.shape
    h = jnp.transpose(h, (0, 2, 1, 3)).reshape(b, t, c * f)
    y = jnp.einsum("btf,of->bto", h, wl, precision=lax.Precision.HIGHEST) + bl
    if x_mask is None:
        return y, None
    return y, x_mask[:, :, :-2:2][:, :, :-2:2]


if __name__ == "__main__":
    B, T, IDIM, ODIM = 2, 16, 16, 32          # small shapes; dropout_rate = 0 (eval)
    F2 = _conv_out(_conv_out(IDIM))
    T2 = _conv_out(_conv_out(T))

    key = jax.random.PRNGKey(0)
    ks = jax.random.split(key, 8)
    params = {
        "w1": jax.random.normal(ks[0], (ODIM, 1, 3, 3), jnp.float32) * 0.2,
        "b1": jax.random.normal(ks[1], (ODIM,), jnp.float32) * 0.1,
        "w2": jax.random.normal(ks[2], (ODIM, ODIM, 3, 3), jnp.float32) * 0.05,
        "b2": jax.random.normal(ks[3], (ODIM,), jnp.float32) * 0.1,
        "wl": jax.random.normal(ks[4], (ODIM, ODIM * F2), jnp.float32) * 0.05,
        "bl": jax.random.normal(ks[5], (ODIM,), jnp.float32) * 0.1,
    }
    x = jax.random.normal(ks[6], (B, 1, T, IDIM), jnp.float32)
    x_mask = jnp.ones((B, 1, T), dtype=bool)

    y_ref, mask_ref = reference_forward(x, params, x_mask)

    # Optimized bf16-MXU path (default).
    y_bf, mask = conv2d_subsampling_forward(x, params, x_mask)
    y_bf = jax.block_until_ready(y_bf)
    np.testing.assert_allclose(np.asarray(y_bf), np.asarray(y_ref), rtol=5e-2, atol=5e-2)

    # Full-f32 path for a tight numerical check.
    y_f32, _ = conv2d_subsampling_forward(x, params, x_mask, compute_dtype=jnp.float32)
    y_f32 = jax.block_until_ready(y_f32)
    np.testing.assert_allclose(np.asarray(y_f32), np.asarray(y_ref), rtol=1e-3, atol=1e-3)

    assert y_bf.shape == (B, T2, ODIM)
    assert mask.shape == mask_ref.shape and bool(jnp.all(mask == mask_ref))
    print("KERNEL_OK")
</pallas_src>

<mosaic_0001>
module attributes {stable_mosaic.version = 11 : i64} {
  func.func @kernel(%arg0: i32, %arg1: memref<1x9x81xbf16, #tpu.memory_space<vmem>>, %arg2: memref<81x288xbf16, #tpu.memory_space<vmem>>, %arg3: memref<1x288xf32, #tpu.memory_space<vmem>>, %arg4: memref<288x32xbf16, #tpu.memory_space<vmem>>, %arg5: memref<1x32xf32, #tpu.memory_space<vmem>>, %arg6: memref<3x32x128xbf16, #tpu.memory_space<vmem>>, %arg7: memref<1x128xf32, #tpu.memory_space<vmem>>, %arg8: memref<1x3x128xf32, #tpu.memory_space<vmem>>) attributes {dimension_semantics = [#tpu.dimension_semantics<parallel>], iteration_bounds = array<i64: 2>, scalar_prefetch = 0 : i64, scratch_operands = 0 : i64, tpu.core_type = #tpu.core_type<tc>, window_params = [{transform_indices = @transform_0, window_bounds = array<i64: 1, 9, 81>}, {pipeline_mode = #tpu.pipeline_mode<synchronous>, transform_indices = @transform_1, window_bounds = array<i64: 81, 288>}, {pipeline_mode = #tpu.pipeline_mode<synchronous>, transform_indices = @transform_2, window_bounds = array<i64: 1, 288>}, {pipeline_mode = #tpu.pipeline_mode<synchronous>, transform_indices = @transform_3, window_bounds = array<i64: 288, 32>}, {pipeline_mode = #tpu.pipeline_mode<synchronous>, transform_indices = @transform_4, window_bounds = array<i64: 1, 32>}, {pipeline_mode = #tpu.pipeline_mode<synchronous>, transform_indices = @transform_5, window_bounds = array<i64: 3, 32, 128>}, {pipeline_mode = #tpu.pipeline_mode<synchronous>, transform_indices = @transform_6, window_bounds = array<i64: 1, 128>}, {transform_indices = @transform_7, window_bounds = array<i64: 1, 3, 128>}]} {
    %c0 = arith.constant 0 : index
    %c0_0 = arith.constant 0 : index
    %c0_1 = arith.constant 0 : index
    %0 = vector.load %arg1[%c0, %c0_0, %c0_1] : memref<1x9x81xbf16, #tpu.memory_space<vmem>>, vector<1x9x81xbf16>
    %1 = vector.shape_cast %0 : vector<1x9x81xbf16> to vector<9x81xbf16>
    %c0_2 = arith.constant 0 : index
    %c0_3 = arith.constant 0 : index
    %2 = vector.load %arg2[%c0_2, %c0_3] : memref<81x288xbf16, #tpu.memory_space<vmem>>, vector<81x288xbf16>
    %cst = arith.constant dense<0.000000e+00> : vector<9x288xf32>
    %3 = tpu.matmul %1, %2, %cst {dimension_numbers = #tpu.dot_dimension_numbers<[1], [0], [0], [1], [0, 0, 1, 1], [], []>} : vector<9x81xbf16>, vector<81x288xbf16>, vector<9x288xf32> -> vector<9x288xf32>
    %c0_4 = arith.constant 0 : index
    %c0_5 = arith.constant 0 : index
    %4 = vector.load %arg3[%c0_4, %c0_5] : memref<1x288xf32, #tpu.memory_space<vmem>>, vector<1x288xf32>
    %5 = vector.broadcast %4 : vector<1x288xf32> to vector<9x288xf32>
    %6 = arith.addf %3, %5 : vector<9x288xf32>
    %cst_6 = arith.constant 0.000000e+00 : f32
    %7 = vector.broadcast %cst_6 : f32 to vector<9x288xf32>
    %8 = arith.maximumf %6, %7 : vector<9x288xf32>
    %9 = arith.truncf %8 : vector<9x288xf32> to vector<9x288xbf16>
    %c0_7 = arith.constant 0 : index
    %c0_8 = arith.constant 0 : index
    %10 = vector.load %arg4[%c0_7, %c0_8] : memref<288x32xbf16, #tpu.memory_space<vmem>>, vector<288x32xbf16>
    %cst_9 = arith.constant dense<0.000000e+00> : vector<9x32xf32>
    %11 = tpu.matmul %9, %10, %cst_9 {dimension_numbers = #tpu.dot_dimension_numbers<[1], [0], [0], [1], [0, 0, 1, 1], [], []>} : vector<9x288xbf16>, vector<288x32xbf16>, vector<9x32xf32> -> vector<9x32xf32>
    %c0_10 = arith.constant 0 : index
    %c0_11 = arith.constant 0 : index
    %12 = vector.load %arg5[%c0_10, %c0_11] : memref<1x32xf32, #tpu.memory_space<vmem>>, vector<1x32xf32>
    %13 = vector.broadcast %12 : vector<1x32xf32> to vector<9x32xf32>
    %14 = arith.addf %11, %13 : vector<9x32xf32>
    %cst_12 = arith.constant 0.000000e+00 : f32
    %15 = vector.broadcast %cst_12 : f32 to vector<9x32xf32>
    %16 = arith.maximumf %14, %15 : vector<9x32xf32>
    %17 = arith.truncf %16 : vector<9x32xf32> to vector<9x32xbf16>
    %cst_13 = arith.constant 0.000000e+00 : f32
    %18 = vector.broadcast %cst_13 : f32 to vector<3x128xf32>
    %19 = vector.extract_strided_slice %17 {offsets = [0, 0], sizes = [3, 32], strides = [1, 1]} : vector<9x32xbf16> to vector<3x32xbf16>
    %c0_14 = arith.constant 0 : index
    %c0_15 = arith.constant 0 : index
    %c0_16 = arith.constant 0 : index
    %20 = vector.load %arg6[%c0_14, %c0_15, %c0_16] : memref<3x32x128xbf16, #tpu.memory_space<vmem>>, vector<1x32x128xbf16>
    %21 = vector.shape_cast %20 : vector<1x32x128xbf16> to vector<32x128xbf16>
    %cst_17 = arith.constant dense<0.000000e+00> : vector<3x128xf32>
    %22 = tpu.matmul %19, %21, %cst_17 {dimension_numbers = #tpu.dot_dimension_numbers<[1], [0], [0], [1], [0, 0, 1, 1], [], []>} : vector<3x32xbf16>, vector<32x128xbf16>, vector<3x128xf32> -> vector<3x128xf32>
    %23 = arith.addf %18, %22 : vector<3x128xf32>
    %24 = vector.extract_strided_slice %17 {offsets = [3, 0], sizes = [3, 32], strides = [1, 1]} : vector<9x32xbf16> to vector<3x32xbf16>
    %c1 = arith.constant 1 : index
    %c0_18 = arith.constant 0 : index
    %c0_19 = arith.constant 0 : index
    %25 = vector.load %arg6[%c1, %c0_18, %c0_19] : memref<3x32x128xbf16, #tpu.memory_space<vmem>>, vector<1x32x128xbf16>
    %26 = vector.shape_cast %25 : vector<1x32x128xbf16> to vector<32x128xbf16>
    %cst_20 = arith.constant dense<0.000000e+00> : vector<3x128xf32>
    %27 = tpu.matmul %24, %26, %cst_20 {dimension_numbers = #tpu.dot_dimension_numbers<[1], [0], [0], [1], [0, 0, 1, 1], [], []>} : vector<3x32xbf16>, vector<32x128xbf16>, vector<3x128xf32> -> vector<3x128xf32>
    %28 = arith.addf %23, %27 : vector<3x128xf32>
    %29 = vector.extract_strided_slice %17 {offsets = [6, 0], sizes = [3, 32], strides = [1, 1]} : vector<9x32xbf16> to vector<3x32xbf16>
    %c2 = arith.constant 2 : index
    %c0_21 = arith.constant 0 : index
    %c0_22 = arith.constant 0 : index
    %30 = vector.load %arg6[%c2, %c0_21, %c0_22] : memref<3x32x128xbf16, #tpu.memory_space<vmem>>, vector<1x32x128xbf16>
    %31 = vector.shape_cast %30 : vector<1x32x128xbf16> to vector<32x128xbf16>
    %cst_23 = arith.constant dense<0.000000e+00> : vector<3x128xf32>
    %32 = tpu.matmul %29, %31, %cst_23 {dimension_numbers = #tpu.dot_dimension_numbers<[1], [0], [0], [1], [0, 0, 1, 1], [], []>} : vector<3x32xbf16>, vector<32x128xbf16>, vector<3x128xf32> -> vector<3x128xf32>
    %33 = arith.addf %28, %32 : vector<3x128xf32>
    %c0_24 = arith.constant 0 : index
    %c0_25 = arith.constant 0 : index
    %34 = vector.load %arg7[%c0_24, %c0_25] : memref<1x128xf32, #tpu.memory_space<vmem>>, vector<1x128xf32>
    %35 = vector.broadcast %34 : vector<1x128xf32> to vector<3x128xf32>
    %36 = arith.addf %33, %35 : vector<3x128xf32>
    %c0_26 = arith.constant 0 : index
    %c0_27 = arith.constant 0 : index
    %c0_28 = arith.constant 0 : index
    %37 = vector.load %arg8[%c0_26, %c0_27, %c0_28] : memref<1x3x128xf32, #tpu.memory_space<vmem>>, vector<1x3x128xf32>
    %38 = vector.shape_cast %37 : vector<1x3x128xf32> to vector<3x128xf32>
    %39 = vector.shape_cast %36 : vector<3x128xf32> to vector<1x3x128xf32>
    tpu.vector_store %arg8[%c0_26, %c0_27, %c0_28], %39 {strides = array<i32>} : memref<1x3x128xf32, #tpu.memory_space<vmem>>, vector<1x3x128xf32>,
    return
  }
  func.func @transform_0(%arg0: i32) -> (i32, i32, i32) {
    %c0_i32 = arith.constant 0 : i32
    %c0_i32_0 = arith.constant 0 : i32
    %c0_i32_1 = arith.constant 0 : i32
    return %arg0, %c0_i32, %c0_i32_0 : i32, i32, i32
  }
  func.func @transform_1(%arg0: i32) -> (i32, i32) {
    %c0_i32 = arith.constant 0 : i32
    %c0_i32_0 = arith.constant 0 : i32
    %c0_i32_1 = arith.constant 0 : i32
    return %c0_i32, %c0_i32_0 : i32, i32
  }
  func.func @transform_2(%arg0: i32) -> (i32, i32) {
    %c0_i32 = arith.constant 0 : i32
    %c0_i32_0 = arith.constant 0 : i32
    %c0_i32_1 = arith.constant 0 : i32
    return %c0_i32, %c0_i32_0 : i32, i32
  }
  func.func @transform_3(%arg0: i32) -> (i32, i32) {
    %c0_i32 = arith.constant 0 : i32
    %c0_i32_0 = arith.constant 0 : i32
    %c0_i32_1 = arith.constant 0 : i32
    return %c0_i32, %c0_i32_0 : i32, i32
  }
  func.func @transform_4(%arg0: i32) -> (i32, i32) {
    %c0_i32 = arith.constant 0 : i32
    %c0_i32_0 = arith.constant 0 : i32
    %c0_i32_1 = arith.constant 0 : i32
    return %c0_i32, %c0_i32_0 : i32, i32
  }
  func.func @transform_5(%arg0: i32) -> (i32, i32, i32) {
    %c0_i32 = arith.constant 0 : i32
    %c0_i32_0 = arith.constant 0 : i32
    %c0_i32_1 = arith.constant 0 : i32
    %c0_i32_2 = arith.constant 0 : i32
    return %c0_i32, %c0_i32_0, %c0_i32_1 : i32, i32, i32
  }
  func.func @transform_6(%arg0: i32) -> (i32, i32) {
    %c0_i32 = arith.constant 0 : i32
    %c0_i32_0 = arith.constant 0 : i32
    %c0_i32_1 = arith.constant 0 : i32
    return %c0_i32, %c0_i32_0 : i32, i32
  }
  func.func @transform_7(%arg0: i32) -> (i32, i32, i32) {
    %c0_i32 = arith.constant 0 : i32
    %c0_i32_0 = arith.constant 0 : i32
    %c0_i32_1 = arith.constant 0 : i32
    return %arg0, %c0_i32, %c0_i32_0 : i32, i32, i32
  }
}

</mosaic_0001>

<bundles_post_ra>
// kernel: tpu_custom_call.1
= control target key start
LH: loop header
LB: loop body
LE: loop exit
PB: predicated region body
PF: predicated region fallthrough
CT: control target
= control target key end

     0   :  { %s1127_s24 = smov 0   ;;  %s1339_s0 = inlined_call_operand.vmem [shape: bf16[2,9,81], index: 0, kind: input, shape index: {}]   ;;  %s1340_s1 = inlined_call_operand.vmem [shape: bf16[81,288], index: 1, kind: input, shape index: {}]   ;;  %s1341_s2 = inlined_call_operand.vmem [shape: f32[1,288], index: 2, kind: input, shape index: {}]   ;;  %s1342_s3 = inlined_call_operand.vmem [shape: bf16[288,32], index: 3, kind: input, shape index: {}]   ;;  %s1343_s4 = inlined_call_operand.vmem [shape: f32[1,32], index: 4, kind: input, shape index: {}]   ;;  %s1344_s5 = inlined_call_operand.vmem [shape: bf16[3,32,128], index: 5, kind: input, shape index: {}]   ;;  %s1345_s6 = inlined_call_operand.vmem [shape: f32[1,128], index: 6, kind: input, shape index: {}]   ;;  %s1346_s7 = inlined_call_operand.vmem [shape: f32[2,3,128], index: 7, kind: output, shape index: {}]  }
   0x1 LB: > { %s841_s25 = sadd.s32 4294967295, %s1084_s24   ;;  %p845_p0 = scmp.ge.s32.totalorder %s1084_s24, 1  ;;  %s1084_s24 = sphi %s1127_s24, %s17_s24  }
   0x2   : > { %p237_p1 = scmp.lt.s32.totalorder %s1084_s24, 3 }
   0x4   : > { %p238_p2 = pnand %p845_p0, %p237_p1 }
   0x5   : > { %p1179_p3 = scmp.lt.s32.totalorder (!%p238_p2), %s841_s25, 1 }
   0x6   : > { %241 = sbr.rel (%p238_p2) target bundleno = 473 (0x1d9), region = 48 }
   0xb   : > { %v300_v0 = vld [vmem:[%s1340_s1 + $0x78] sm:$0x11]  ;;  %vm407_vm0 = vcmask 1040384   ;;  %v301_v1 = vld [vmem:[%s1340_s1 + $0x80] sm:$0x1]  ;;  %v1086_v5 = vmov 0  }
   0xc   : > { %v367_v2 = vunpack.c.l.b16 %v300_v0  ;;  %v368_v3 = vunpack.c.h.b16 %v300_v0  ;;  %v369_v4 = vunpack.c.l.b16 %v301_v1  ;;  %v409_v6 = vsel %vm407_vm0, 65535, %v1086_v5  ;;  %v903_v10 = vld [vmem:[%s1340_s1 + $0x60] sm:$0xf]  ;;  %v1041_v11 = vld [vmem:[%s1340_s1 + $0x68] sm:$0xf0]  ;;  %v1050_v31 = vld [vmem:[%s1342_s3 + $0x38] sm:$0xff] }
   0xd   : > { %v1040_v12 = vld [vmem:[%s1340_s1 + $0x64] sm:$0xf]  ;;  %v905_v13 = vld [vmem:[%s1340_s1 + $0x6c] sm:$0xf0]  ;;  %v911_v17 = vld [vmem:[%s1340_s1 + $0x68] sm:$0xf]  ;;  %v904_v19 = vor.u32 %v1041_v11, %v903_v10  ;;  %622 = vmatpush.bf16.msra.mxu3 %v1050_v31 }
   0xe   : > { %v385_v7 = vpack.c.b16 %v367_v2, %v367_v2  ;;  %v386_v8 = vpack.c.b16 %v368_v3, %v368_v3  ;;  %v387_v9 = vpack.c.b16 %v369_v4, %v369_v4  ;;  %v1042_v18 = vld [vmem:[%s1340_s1 + $0x70] sm:$0xf0]  ;;  %v908_v20 = vor.u32 %v1040_v12, %v905_v13  ;;  %v891_v21 = vld [vmem:[%s1340_s1 + $0x48] sm:$0xf]  ;;  %v1037_v24 = vld [vmem:[%s1340_s1 + $0x4c] sm:$0xf] }
   0xf   : > { %v912_v22 = vor.u32 %v1042_v18, %v911_v17  ;;  %v1038_v23 = vld [vmem:[%s1340_s1 + $0x50] sm:$0xf0]  ;;  %v893_v25 = vld [vmem:[%s1340_s1 + $0x54] sm:$0xf0]  ;;  %v899_v26 = vld [vmem:[%s1340_s1 + $0x50] sm:$0xf] }
  0x10   : > { %v411_v14 = vand.u32 %v409_v6, %v385_v7  ;;  %v414_v15 = vand.u32 %v409_v6, %v386_v8  ;;  %v417_v16 = vand.u32 %v409_v6, %v387_v9  ;;  %v1039_v27 = vld [vmem:[%s1340_s1 + $0x58] sm:$0xf0]  ;;  %v892_v28 = vor.u32 %v1038_v23, %v891_v21  ;;  %v879_v30 = vld [vmem:[%s1340_s1 + $0x30] sm:$0xf]  ;;  %v1034_v34 = vld [vmem:[%s1340_s1 + $0x34] sm:$0xf] }
  0x11   : > { %v896_v29 = vor.u32 %v1037_v24, %v893_v25  ;;  %v900_v32 = vor.u32 %v1039_v27, %v899_v26  ;;  %v1035_v33 = vld [vmem:[%s1340_s1 + $0x38] sm:$0xf0]  ;;  %v881_v35 = vld [vmem:[%s1340_s1 + $0x3c] sm:$0xf0]  ;;  %v887_v36 = vld [vmem:[%s1340_s1 + $0x38] sm:$0xf] }
  0x12   : > { %421 = vmatpush.bf16.msra.mxu0 %v411_v14  ;;  %435 = vmatpush.bf16.msra.mxu1 %v414_v15  ;;  %v1036_v37 = vld [vmem:[%s1340_s1 + $0x40] sm:$0xf0]  ;;  %s1349_s25 = smov (!%p1179_p3, %s841_s25), 1  ;;  %v1049_v38 = vld [vmem:[%s1342_s3 + $0x30] sm:$0xff]  ;;  %v880_v39 = vor.u32 %v1035_v33, %v879_v30  ;;  %v884_v40 = vor.u32 %v1034_v34, %v881_v35  ;;  %v867_v41 = vld [vmem:[%s1340_s1 + $0x18] sm:$0xf] }
  0x13   : > { %449 = vmatpush.bf16.msra.mxu2 %v417_v16  ;;  %v888_v42 = vor.u32 %v1036_v37, %v887_v36  ;;  %v1032_v43 = vld [vmem:[%s1340_s1 + $0x20] sm:$0xf0]  ;;  %v1031_v44 = vld [vmem:[%s1340_s1 + $0x1c] sm:$0xf]  ;;  %v869_v45 = vld [vmem:[%s1340_s1 + $0x24] sm:$0xf0]  ;;  %623 = vmatpush.bf16.msra.mxu3 %v1049_v38 }
  0x14   : > { %v875_v46 = vld [vmem:[%s1340_s1 + $0x20] sm:$0xf]  ;;  %v1033_v47 = vld [vmem:[%s1340_s1 + $0x28] sm:$0xf0]  ;;  %s1026_s18 = sshll.u32 %s1349_s25, 3  ;;  %v868_v49 = vor.u32 %v1032_v43, %v867_v41  ;;  %v872_v50 = vor.u32 %v1031_v44, %v869_v45  ;;  %v1058_v0 = vld [vmem:[%s1342_s3 + $0x78] sm:$0xff] }
  0x15   : > { %v1048_v48 = vld [vmem:[%s1342_s3 + $0x28] sm:$0xff]  ;;  %v855_v51 = vld [vmem:[%s1340_s1] sm:$0xf]  ;;  %v876_v52 = vor.u32 %v1033_v47, %v875_v46  ;;  %v1028_v54 = vld [vmem:[%s1340_s1 + $0x4] sm:$0xf]  ;;  %s272_s10 = scalar_lea.vmem %s1339_s0, %s1026_s18  ;;  %vm403_vm1 = vcmask 662528  }
  0x16   : > { %422 = vmatpush.bf16.msra.mxu0 %v904_v19  ;;  %436 = vmatpush.bf16.msra.mxu1 %v908_v20  ;;  %v1029_v53 = vld [vmem:[%s1340_s1 + $0x8] sm:$0xf0]  ;;  %v857_v55 = vld [vmem:[%s1340_s1 + $0xc] sm:$0xf0]  ;;  %v863_v56 = vld [vmem:[%s1340_s1 + $0x8] sm:$0xf] }
  0x17   : > { %450 = vmatpush.bf16.msra.mxu2 %v912_v22  ;;  %v1030_v57 = vld [vmem:[%s1340_s1 + $0x10] sm:$0xf0]  ;;  %624 = vmatpush.bf16.msra.mxu3 %v1048_v48  ;;  %v1047_v58 = vld [vmem:[%s1342_s3 + $0x20] sm:$0xff]  ;;  %v856_v59 = vor.u32 %v1029_v53, %v855_v51  ;;  %v860_v60 = vor.u32 %v1028_v54, %v857_v55  ;;  %v1056_v3 = vld [vmem:[%s1342_s3 + $0x68] sm:$0xff]  ;;  %vm618_vm2 = vcmask 261120   ;;  %s848_s19 = sshll.u32 %s1349_s25, 2 }
  0x18   : > { %v851_v61 = vld [vmem:[%s272_s10] sm:$0xf]  ;;  %v1027_v62 = vld [vmem:[%s272_s10] sm:$0x10]  ;;  %v864_v63 = vor.u32 %v1030_v57, %v863_v56  ;;  %v1057_v2 = vld [vmem:[%s1342_s3 + $0x70] sm:$0xff]  ;;  %s276_s26 = scalar_lea.vmem %s1346_s7, %s848_s19 }
  0x19   : > { %v852_v1 = vor.u32 %v1027_v62, %v851_v61  ;;  %v1055_v4 = vld [vmem:[%s1342_s3 + $0x60] sm:$0xff]  ;;  %v1046_v5 = vld [vmem:[%s1342_s3 + $0x18] sm:$0xff]  ;;  %v1045_v7 = vld [vmem:[%s1342_s3 + $0x10] sm:$0xff] }
  0x1a   : > { %423 = vmatpush.bf16.msra.mxu0 %v892_v28  ;;  %437 = vmatpush.bf16.msra.mxu1 %v896_v29  ;;  %v1054_v6 = vld [vmem:[%s1342_s3 + $0x58] sm:$0xff]  ;;  %v1053_v8 = vld [vmem:[%s1342_s3 + $0x50] sm:$0xff]  ;;  %v1044_v9 = vld [vmem:[%s1342_s3 + $0x8] sm:$0xff] }
  0x1b   : > { %451 = vmatpush.bf16.msra.mxu2 %v900_v32  ;;  %625 = vmatpush.bf16.msra.mxu3 %v1047_v58  ;;  %v1052_v10 = vld [vmem:[%s1342_s3 + $0x48] sm:$0xff]  ;;  %v1043_v11 = vld [vmem:[%s1342_s3] sm:$0xff]  ;;  %v1063_v44 = vld [vmem:[%s1344_s5 + $0x10] sm:$0xff] }
  0x1c   : > { %v1051_v12 = vld [vmem:[%s1342_s3 + $0x40] sm:$0xff]  ;;  %v1060_v13 = vld [vmem:[%s1342_s3 + $0x88] sm:$0xff] }
  0x1d   : > { %v1059_v14 = vld [vmem:[%s1342_s3 + $0x80] sm:$0xff]  ;;  %v1066_v43 = vld [vmem:[%s1344_s5 + $0x28] sm:$0xff] }
  0x1e   : > { %424 = vmatpush.bf16.msra.mxu0 %v880_v39  ;;  %438 = vmatpush.bf16.msra.mxu1 %v884_v40  ;;  %v302_v15 = vld [vmem:[%s1341_s2] sm:$0x7]  ;;  %v1062_v40 = vld [vmem:[%s1344_s5 + $0x8] sm:$0xff] }
  0x1f   : > { %452 = vmatpush.bf16.msra.mxu2 %v888_v42  ;;  %626 = vmatpush.bf16.msra.mxu3 %v1046_v5  ;;  %v305_v18 = vperm.slane %v302_v15, 1  ;;  %v304_v19 = vperm.slane %v302_v15, 0  ;;  %v306_v28 = vperm.slane %v302_v15, 2  ;;  %v1061_v41 = vld [vmem:[%s1344_s5] sm:$0xff]  ;;  %v1064_v42 = vld [vmem:[%s1344_s5 + $0x18] sm:$0xff] }
  0x20   : > { %v1065_v45 = vld [vmem:[%s1344_s5 + $0x20] sm:$0xff] }
  0x21   : > { %v1076_v46 = vld [vmem:[%s1343_s4] ss:$0 sm:$0xff] }
  0x22   : > { %425 = vmatpush.bf16.msra.mxu0 %v868_v49  ;;  %439 = vmatpush.bf16.msra.mxu1 %v872_v50 }
  0x23   : > { %453 = vmatpush.bf16.msra.mxu2 %v876_v52  ;;  %627 = vmatpush.bf16.msra.mxu3 %v1045_v7 }
  0x26   : > { %426 = vmatpush.bf16.msra.mxu0 %v856_v59  ;;  %440 = vmatpush.bf16.msra.mxu1 %v860_v60 }
  0x27   : > { %454 = vmatpush.bf16.msra.mxu2 %v864_v63  ;;  %628 = vmatpush.bf16.msra.mxu3 %v1044_v9 }
  0x29   : > { %913 = vmatmul.msk.bf16.vlgmr.msra.gmra.mxu0 %vm403_vm1, %v852_v1  ;;  %914 = vmatmul.msk.bf16.vlgmr.msra.gmra.mxu1 %vm403_vm1, %v852_v1 }
  0x2a   : > { %636 = vmatpush.bf16.msrb.mxu0 %v1058_v0  ;;  %915 = vmatmul.msk.bf16.vlgmr.msra.gmra.mxu2 %vm403_vm1, %v852_v1 }
  0x2b   : > { %629 = vmatpush.bf16.msra.mxu3 %v1043_v11  ;;  %656 = vmatpush.bf16.msrb.mxu1 %v1060_v13 }
  0x2c   : > { %709 = vmatpush.bf16.msrb.mxu2 %v1064_v42 }
  0x2e   : > { %637 = vmatpush.bf16.msrb.mxu0 %v1057_v2 }
  0x2f   : > { %657 = vmatpush.bf16.msrb.mxu1 %v1059_v14  ;;  %737 = vmatpush.bf16.msrb.mxu3 %v1062_v40  ;;  %v1077_v14 = vld [vmem:[%s1345_s6] ss:$0 sm:$0xff] }
  0x30   : > { %710 = vmatpush.bf16.msrb.mxu2 %v1063_v44 }
  0x32   : > { %638 = vmatpush.bf16.msrb.mxu0 %v1056_v3 }
  0x33   : > { %738 = vmatpush.bf16.msrb.mxu3 %v1061_v41  ;;  %774 = vmatpush.bf16.msra.mxu1 %v1066_v43 }
  0x36   : > { %639 = vmatpush.bf16.msrb.mxu0 %v1055_v4 }
  0x37   : > { %775 = vmatpush.bf16.msra.mxu1 %v1065_v45 }
  0x3a   : > { %640 = vmatpush.bf16.msrb.mxu0 %v1054_v6 }
  0x3e   : > { %641 = vmatpush.bf16.msrb.mxu0 %v1053_v8 }
  0x42   : > { %642 = vmatpush.bf16.msrb.mxu0 %v1052_v10 }
  0x46   : > { %643 = vmatpush.bf16.msrb.mxu0 %v1051_v12 }
  0xa6   : > { %v428_v16 = vpop.f32.mrf.mxu0  ;;  %v442_v17 = vpop.f32.mrf.mxu1 }
  0xa7   : > { %v443_v20 = vadd.f32 %v442_v17, %v305_v18  ;;  %v429_v21 = vadd.f32 %v428_v16, %v304_v19 }
  0xa9   : > { %v462_v25 = vmax.f32 %v443_v20, 0.0  ;;  %v461_v29 = vmax.f32 %v429_v21, 0.0 }
  0xad   : > { %v456_v22 = vpop.f32.mrf.mxu2 }
  0xae   : > { %v430_v23 = vpop.f32.mrf.mxu0  ;;  %v444_v24 = vpop.f32.mrf.mxu1  ;;  %v457_v34 = vadd.f32 %v456_v22, %v306_v28 }
  0xaf   : > { %v431_v26 = vadd.f32 %v430_v23, %v304_v19  ;;  %v445_v27 = vadd.f32 %v444_v24, %v305_v18 }
  0xb0   : > { %v463_v37 = vmax.f32 %v457_v34, 0.0 }
  0xb1   : > { %v464_v30 = vmax.f32 %v431_v26, 0.0  ;;  %v465_v31 = vmax.f32 %v445_v27, 0.0 }
  0xb3   : > { %v468_v32 = vpack.c.bf16 %v465_v31, %v462_v25  ;;  %v467_v33 = vpack.c.bf16 %v464_v30, %v461_v29 }
  0xb5   : > { %v458_v35 = vpop.f32.mrf.mxu2  ;;  %630 = vmatmul.bf16.vlgmr.msra.gmra.mxu3 %v467_v33  ;;  %644 = vmatmul.bf16.vlgmr.msrb.gmra.mxu0 %v468_v32 }
  0xb6   : > { %v459_v36 = vadd.f32 %v458_v35, %v306_v28 }
  0xb8   : > { %v466_v38 = vmax.f32 %v459_v36, 0.0 }
  0xba   : > { %v469_v39 = vpack.c.bf16 %v466_v38, %v463_v37 }
  0xbc   : > { %988 = vmatmul.msk.bf16.vlgmr.msrb.gmra.mxu1 %vm618_vm2, %v469_v39 }
 0x132   : > { %v645_v47 = vpop.f32.mrf.mxu0 }
 0x138   : > { %v631_v48 = vpop.f32.mrf.mxu3 }
 0x139   : > { %v632_v49 = vadd.f32 %v1076_v46, %v631_v48  ;;  %v659_v50 = vpop.f32.mrf.mxu1 }
 0x13a   : > { %v647_v57 = vpop.f32.mrf.mxu0 }
 0x13b   : > { %v646_v51 = vadd.f32 %v645_v47, %v632_v49 }
 0x13d   : > { %v660_v52 = vadd.f32 %v659_v50, %v646_v51 }
 0x13f   : > { %v664_v53 = vmax.f32 %v660_v52, 0.0 }
 0x140   : > { %v633_v54 = vpop.f32.mrf.mxu3 }
 0x141   : > { %v666_v55 = vpack.c.bf16 %v664_v53, %v664_v53  ;;  %v634_v56 = vadd.f32 %v1076_v46, %v633_v54  ;;  %v661_v60 = vpop.f32.mrf.mxu1 }
 0x143   : > { %v678_v58 = vunpack.c.l.b16 %v666_v55  ;;  %v648_v59 = vadd.f32 %v647_v57, %v634_v56  ;;  %1010 = vmatmul.msk.bf16.vlgmr.msrb.gmra.mxu3 %vm618_vm2, %v666_v55 }
 0x145   : > { %v679_v61 = vpack.c.b16 %v678_v58, %v678_v58  ;;  %v662_v62 = vadd.f32 %v661_v60, %v648_v59 }
 0x147   : > { %v681_v63 = vshrl.u32 %v679_v61, 16  ;;  %v684_v0 = vshll.u32 %v679_v61, 16  ;;  %v665_v1 = vmax.f32 %v662_v62, 0.0 }
 0x149   : > { %v683_v2 = vrot.slane %v681_v63, 1  ;;  %v686_v3 = vrot.slane %v684_v0, 2  ;;  %v667_v4 = vpack.c.bf16 %v665_v1, %v665_v1 }
 0x14b   : > { %v750_v5 = vunpack.c.l.b16 %v667_v4  ;;  %v687_v6 = vor.u32 %v686_v3, %v683_v2 }
 0x14d   : > { %v751_v7 = vpack.c.b16 %v750_v5, %v678_v58  ;;  %1001 = vmatmul.msk.bf16.vlgmr.msrb.gmra.mxu2 %vm618_vm2, %v687_v6 }
 0x14f   : > { %v752_v8 = vrot.slane %v751_v7, 3 }
 0x151   : > { %1023 = vmatmul.msk.bf16.vlgmr.msra.gmra.mxu1 %vm618_vm2, %v752_v8 }
 0x1c6   : > { %v740_v9 = vpop.f32.mrf.mxu3 }
 0x1ce   : > { %v742_v10 = vpop.f32.mrf.mxu3  ;;  %v777_v11 = vpop.f32.mrf.mxu1 }
 0x1d0   : > { %v712_v12 = vpop.f32.mrf.mxu2 }
 0x1d1   : > { %v741_v13 = vadd.f32 %v740_v9, %v712_v12 }
 0x1d3   : > { %v781_v15 = vadd.f32 %v777_v11, %v741_v13 }
 0x1d5   : > { %v786_v16 = vadd.f32 %v1077_v14, %v781_v15 }
 0x1d6   : > { %v779_v17 = vpop.f32.mrf.mxu1 }
 0x1d7   : > { %787 = vst [vmem:[%s276_s26] sm:$0x7] %v786_v16 }
 0x1d8   : > { %v714_v18 = vpop.f32.mrf.mxu2 }
 0x1d9 PF: > { %s17_s24 = sadd.s32 1, %s1084_s24  }
 0x1da   : > { %p14_p4 = scmp.ge.s32.totalorder %s17_s24, 4  }
 0x1dc   :  { %16 = sbr.rel (!%p14_p4) target bundleno = 1 (0x1), region = 80 }

</bundles_post_ra>
